<compile_context>
chip_gen: v5e
topology: v5e:2x2
jax: 0.10.0
libtpu: 0.0.40
codegen_flags: <defaults>
</compile_context>

<pallas_src>
import functools

import jax
import jax.numpy as jnp
from jax.experimental import pallas as pl
from jax.experimental.pallas import tpu as pltpu


def _round_up(x, m):
    return ((x + m - 1) // m) * m


def _outconv_kernel(x_ref, w_ref, b_ref, o_ref, *, n, cin, cout, s_chunk,
                    l_chunk, compute_dtype):
    """One grid step.

    x_ref: VMEM (n*cin,  S_t, L)   w_ref: SMEM (cout, cin) f32
    o_ref: VMEM (n*cout, S_t, L)   b_ref: SMEM (cout,)     f32

    Pixels are processed in (s_chunk, l_chunk) sub-slabs so the live vreg set
    stays small regardless of how big the DMA block is.  The channel mix is
    done on the VPU with SMEM-scalar broadcast FMAs; each input row chunk is
    loaded from the ref exactly once (ci outer / co inner) and each output row
    chunk is stored densely (no stack along sublanes).
    """
    _, s_t, lanes = x_ref.shape                     # static block shape
    for s0 in range(0, s_t, s_chunk):               # static unroll
        ssl = pl.ds(s0, s_chunk)
        for l0 in range(0, lanes, l_chunk):         # static unroll
            lsl = pl.ds(l0, l_chunk)
            for b in range(n):                      # small static unroll
                accs = [None] * cout
                for ci in range(cin):               # per-channel ref load (once)
                    xr = x_ref[b * cin + ci, ssl, lsl].astype(compute_dtype)
                    for co in range(cout):
                        wv = w_ref[co, ci].astype(compute_dtype)
                        t = xr * wv
                        accs[co] = t if accs[co] is None else accs[co] + t
                for co in range(cout):
                    val = accs[co] + b_ref[co].astype(compute_dtype)
                    # dense per-row store for this (batch, out-channel)
                    o_ref[b * cout + co, ssl, lsl] = val.astype(o_ref.dtype)


def _device_info():
    """Best-effort chip query; conservative defaults if unavailable."""
    vmem_bytes = 64 * 1024 * 1024          # safe lower bound on every TPU gen
    kind = ""
    try:
        kind = str(jax.devices()[0].device_kind).lower()
    except Exception:
        pass
    try:
        vmem_bytes = int(pltpu.get_tpu_info().vmem_capacity_bytes)
    except Exception:
        pass
    two_cores = any(t in kind for t in ("v4", "v7", "7x"))   # megacore chips
    is_v5 = "v5" in kind                                     # no bf16 VALU
    return vmem_bytes, two_cores, is_v5


def outconv_pallas(x_nchw, weight, bias):
    """1x1 conv.  x_nchw: (N, Cin, H, W); weight: (Cout, Cin); bias: (Cout,)."""
    N, Cin, H, W = x_nchw.shape
    Cout = weight.shape[0]
    HW = H * W
    nr_in, nr_out = N * Cin, N * Cout
    itemsize = jnp.dtype(x_nchw.dtype).itemsize

    vmem_bytes, two_cores, is_v5 = _device_info()
    if x_nchw.dtype == jnp.bfloat16 and not is_v5:
        compute_dtype = jnp.bfloat16       # native bf16 VALU on v6e / v7x
    else:
        compute_dtype = jnp.float32

    # VMEM budget: input + output blocks, double-buffered, <= ~1/4 of VMEM.
    budget = max(vmem_bytes // 4, 2 << 20)
    per_px_bytes = 2 * (nr_in + nr_out) * itemsize
    max_px = int(min(32768, max(1024, budget // per_px_bytes)))  # px/channel/block

    if HW % 128 == 0:
        # Dense path: view each channel's pixel stream as an (S, L) matrix so
        # compute slabs fill all sublanes and stores are unmasked.
        L = next(l for l in (512, 256, 128) if HW % l == 0)
        S = HW // L
        if S < 8:
            s_chunk = s_tile = S
        else:
            s_chunk = 8
            s_tile = max(8, (min(S, max_px // L) // 8) * 8)
        steps = pl.cdiv(S, s_tile)
        if two_cores and steps == 1 and s_tile > s_chunk:
            # megacore (v4/v7x): split into (an even) >=2 steps for both cores
            s_tile = max(s_chunk, _round_up(pl.cdiv(S, 2), 8))
            steps = pl.cdiv(S, s_tile)
        l_chunk = L
        x3 = x_nchw.reshape(nr_in, S, L)                  # free view
        out_shape3 = (nr_out, S, L)
        block_in, block_out = (nr_in, s_tile, L), (nr_out, s_tile, L)
        index_map = lambda i: (0, i, 0)
        blk_px = s_tile * L
    else:
        # Ragged fallback: flat lane tiling, last block ragged (handled by the
        # pipeline -- no pad, no slice).
        if HW >= 512:
            l_chunk = 512
        elif HW >= 128:
            l_chunk = 128
        else:
            l_chunk = HW                                   # block == full dim
        n_full = max(1, HW // l_chunk)
        cap = max(1, min(max_px // max(l_chunk, 1), 16))
        lane_tile = l_chunk * min(n_full, cap)
        steps = pl.cdiv(HW, lane_tile)
        s_chunk = 1
        x3 = x_nchw.reshape(nr_in, 1, HW)                  # free view
        out_shape3 = (nr_out, 1, HW)
        block_in, block_out = (nr_in, 1, lane_tile), (nr_out, 1, lane_tile)
        index_map = lambda i: (0, 0, i)
        blk_px = lane_tile

    blk_bytes = 2 * (nr_in + nr_out) * blk_px * itemsize   # double-buffered
    vmem_limit = int(min(vmem_bytes, max(32 << 20, 2 * blk_bytes + (4 << 20))))

    cost = pl.CostEstimate(
        flops=2 * N * HW * Cin * Cout,
        transcendentals=0,
        bytes_accessed=(nr_in + nr_out) * HW * itemsize + (Cout * Cin + Cout) * 4,
    )

    kernel = functools.partial(
        _outconv_kernel, n=N, cin=Cin, cout=Cout,
        s_chunk=s_chunk, l_chunk=l_chunk, compute_dtype=compute_dtype)

    out3 = pl.pallas_call(
        kernel,
        out_shape=jax.ShapeDtypeStruct(out_shape3, x_nchw.dtype),
        grid_spec=pltpu.PrefetchScalarGridSpec(
            num_scalar_prefetch=0,
            grid=(steps,),
            in_specs=[
                pl.BlockSpec(block_in, index_map),
                pl.BlockSpec(memory_space=pltpu.MemorySpace.SMEM),
                pl.BlockSpec(memory_space=pltpu.MemorySpace.SMEM),
            ],
            out_specs=pl.BlockSpec(block_out, index_map),
        ),
        compiler_params=pltpu.CompilerParams(
            dimension_semantics=("parallel",),
            vmem_limit_bytes=vmem_limit),
        cost_estimate=cost,
    )(x3, weight.astype(jnp.float32), bias.astype(jnp.float32))

    return out3.reshape(N, Cout, H, W)                     # free view back


if __name__ == "__main__":
    key = jax.random.PRNGKey(0)
    kx, kw, kb, kx2 = jax.random.split(key, 4)

    N, Cin, Cout, H, W = 2, 4, 3, 16, 16
    x = jax.random.normal(kx, (N, Cin, H, W), dtype=jnp.float32)

    # Deterministic parameter init mimicking nn.Conv2d defaults
    # (uniform in +/- 1/sqrt(fan_in), fan_in = Cin * 1 * 1).
    bound = 1.0 / jnp.sqrt(jnp.float32(Cin))
    weight = jax.random.uniform(kw, (Cout, Cin), jnp.float32, -bound, bound)
    bias = jax.random.uniform(kb, (Cout,), jnp.float32, -bound, bound)

    # Main check (128-divisible HW -> dense (S, L) path).
    y = outconv_pallas(x, weight, bias)
    jax.block_until_ready(y)
    y_ref = jnp.einsum("nchw,oc->nohw", x, weight) + bias[None, :, None, None]
    assert y.shape == (N, Cout, H, W)
    assert jnp.allclose(y, y_ref, atol=1e-5, rtol=1e-5)

    # Ragged check (HW not a multiple of 128 -> flat lane tiling, ragged last
    # block handled by the pipeline; no pad / slice in the wrapper).
    H2, W2 = 16, 25
    x2 = jax.random.normal(kx2, (N, Cin, H2, W2), dtype=jnp.float32)
    y2 = outconv_pallas(x2, weight, bias)
    jax.block_until_ready(y2)
    y2_ref = jnp.einsum("nchw,oc->nohw", x2, weight) + bias[None, :, None, None]
    assert y2.shape == (N, Cout, H2, W2)
    assert jnp.allclose(y2, y2_ref, atol=1e-5, rtol=1e-5)

    print("KERNEL_OK")
</pallas_src>

<mosaic_0001>
module attributes {stable_mosaic.version = 11 : i64} {
  func.func @_outconv_kernel(%arg0: i32, %arg1: memref<8x1x256xf32, #tpu.memory_space<vmem>>, %arg2: memref<3x4xf32, #tpu.memory_space<smem>>, %arg3: memref<3xf32, #tpu.memory_space<smem>>, %arg4: memref<6x1x256xf32, #tpu.memory_space<vmem>>) attributes {dimension_semantics = [#tpu.dimension_semantics<parallel>], iteration_bounds = array<i64: 1>, scalar_prefetch = 0 : i64, scratch_operands = 0 : i64, tpu.core_type = #tpu.core_type<tc>, window_params = [{transform_indices = @transform_0, window_bounds = array<i64: 8, 1, 256>}, {transform_indices = @transform_1, window_bounds = array<i64: 3, 4>}, {transform_indices = @transform_2, window_bounds = array<i64: 3>}, {transform_indices = @transform_3, window_bounds = array<i64: 6, 1, 256>}]} {
    %c0 = arith.constant 0 : index
    %c0_0 = arith.constant 0 : index
    %c0_1 = arith.constant 0 : index
    %0 = vector.load %arg1[%c0, %c0_0, %c0_1] : memref<8x1x256xf32, #tpu.memory_space<vmem>>, vector<1x1x256xf32>
    %1 = vector.shape_cast %0 : vector<1x1x256xf32> to vector<1x256xf32>
    %c0_2 = arith.constant 0 : index
    %c0_3 = arith.constant 0 : index
    %2 = memref.load %arg2[%c0_2, %c0_3] : memref<3x4xf32, #tpu.memory_space<smem>>
    %3 = vector.broadcast %2 : f32 to vector<1x256xf32>
    %4 = arith.mulf %1, %3 : vector<1x256xf32>
    %c1 = arith.constant 1 : index
    %c0_4 = arith.constant 0 : index
    %5 = memref.load %arg2[%c1, %c0_4] : memref<3x4xf32, #tpu.memory_space<smem>>
    %6 = vector.broadcast %5 : f32 to vector<1x256xf32>
    %7 = arith.mulf %1, %6 : vector<1x256xf32>
    %c2 = arith.constant 2 : index
    %c0_5 = arith.constant 0 : index
    %8 = memref.load %arg2[%c2, %c0_5] : memref<3x4xf32, #tpu.memory_space<smem>>
    %9 = vector.broadcast %8 : f32 to vector<1x256xf32>
    %10 = arith.mulf %1, %9 : vector<1x256xf32>
    %c1_6 = arith.constant 1 : index
    %c0_7 = arith.constant 0 : index
    %c0_8 = arith.constant 0 : index
    %11 = vector.load %arg1[%c1_6, %c0_7, %c0_8] : memref<8x1x256xf32, #tpu.memory_space<vmem>>, vector<1x1x256xf32>
    %12 = vector.shape_cast %11 : vector<1x1x256xf32> to vector<1x256xf32>
    %c0_9 = arith.constant 0 : index
    %c1_10 = arith.constant 1 : index
    %13 = memref.load %arg2[%c0_9, %c1_10] : memref<3x4xf32, #tpu.memory_space<smem>>
    %14 = vector.broadcast %13 : f32 to vector<1x256xf32>
    %15 = arith.mulf %12, %14 : vector<1x256xf32>
    %16 = arith.addf %4, %15 : vector<1x256xf32>
    %c1_11 = arith.constant 1 : index
    %c1_12 = arith.constant 1 : index
    %17 = memref.load %arg2[%c1_11, %c1_12] : memref<3x4xf32, #tpu.memory_space<smem>>
    %18 = vector.broadcast %17 : f32 to vector<1x256xf32>
    %19 = arith.mulf %12, %18 : vector<1x256xf32>
    %20 = arith.addf %7, %19 : vector<1x256xf32>
    %c2_13 = arith.constant 2 : index
    %c1_14 = arith.constant 1 : index
    %21 = memref.load %arg2[%c2_13, %c1_14] : memref<3x4xf32, #tpu.memory_space<smem>>
    %22 = vector.broadcast %21 : f32 to vector<1x256xf32>
    %23 = arith.mulf %12, %22 : vector<1x256xf32>
    %24 = arith.addf %10, %23 : vector<1x256xf32>
    %c2_15 = arith.constant 2 : index
    %c0_16 = arith.constant 0 : index
    %c0_17 = arith.constant 0 : index
    %25 = vector.load %arg1[%c2_15, %c0_16, %c0_17] : memref<8x1x256xf32, #tpu.memory_space<vmem>>, vector<1x1x256xf32>
    %26 = vector.shape_cast %25 : vector<1x1x256xf32> to vector<1x256xf32>
    %c0_18 = arith.constant 0 : index
    %c2_19 = arith.constant 2 : index
    %27 = memref.load %arg2[%c0_18, %c2_19] : memref<3x4xf32, #tpu.memory_space<smem>>
    %28 = vector.broadcast %27 : f32 to vector<1x256xf32>
    %29 = arith.mulf %26, %28 : vector<1x256xf32>
    %30 = arith.addf %16, %29 : vector<1x256xf32>
    %c1_20 = arith.constant 1 : index
    %c2_21 = arith.constant 2 : index
    %31 = memref.load %arg2[%c1_20, %c2_21] : memref<3x4xf32, #tpu.memory_space<smem>>
    %32 = vector.broadcast %31 : f32 to vector<1x256xf32>
    %33 = arith.mulf %26, %32 : vector<1x256xf32>
    %34 = arith.addf %20, %33 : vector<1x256xf32>
    %c2_22 = arith.constant 2 : index
    %c2_23 = arith.constant 2 : index
    %35 = memref.load %arg2[%c2_22, %c2_23] : memref<3x4xf32, #tpu.memory_space<smem>>
    %36 = vector.broadcast %35 : f32 to vector<1x256xf32>
    %37 = arith.mulf %26, %36 : vector<1x256xf32>
    %38 = arith.addf %24, %37 : vector<1x256xf32>
    %c3 = arith.constant 3 : index
    %c0_24 = arith.constant 0 : index
    %c0_25 = arith.constant 0 : index
    %39 = vector.load %arg1[%c3, %c0_24, %c0_25] : memref<8x1x256xf32, #tpu.memory_space<vmem>>, vector<1x1x256xf32>
    %40 = vector.shape_cast %39 : vector<1x1x256xf32> to vector<1x256xf32>
    %c0_26 = arith.constant 0 : index
    %c3_27 = arith.constant 3 : index
    %41 = memref.load %arg2[%c0_26, %c3_27] : memref<3x4xf32, #tpu.memory_space<smem>>
    %42 = vector.broadcast %41 : f32 to vector<1x256xf32>
    %43 = arith.mulf %40, %42 : vector<1x256xf32>
    %44 = arith.addf %30, %43 : vector<1x256xf32>
    %c1_28 = arith.constant 1 : index
    %c3_29 = arith.constant 3 : index
    %45 = memref.load %arg2[%c1_28, %c3_29] : memref<3x4xf32, #tpu.memory_space<smem>>
    %46 = vector.broadcast %45 : f32 to vector<1x256xf32>
    %47 = arith.mulf %40, %46 : vector<1x256xf32>
    %48 = arith.addf %34, %47 : vector<1x256xf32>
    %c2_30 = arith.constant 2 : index
    %c3_31 = arith.constant 3 : index
    %49 = memref.load %arg2[%c2_30, %c3_31] : memref<3x4xf32, #tpu.memory_space<smem>>
    %50 = vector.broadcast %49 : f32 to vector<1x256xf32>
    %51 = arith.mulf %40, %50 : vector<1x256xf32>
    %52 = arith.addf %38, %51 : vector<1x256xf32>
    %c0_32 = arith.constant 0 : index
    %53 = memref.load %arg3[%c0_32] : memref<3xf32, #tpu.memory_space<smem>>
    %54 = vector.broadcast %53 : f32 to vector<1x256xf32>
    %55 = arith.addf %44, %54 : vector<1x256xf32>
    %c0_33 = arith.constant 0 : index
    %c0_34 = arith.constant 0 : index
    %c0_35 = arith.constant 0 : index
    %56 = vector.load %arg4[%c0_33, %c0_34, %c0_35] : memref<6x1x256xf32, #tpu.memory_space<vmem>>, vector<1x1x256xf32>
    %57 = vector.shape_cast %56 : vector<1x1x256xf32> to vector<1x256xf32>
    %58 = vector.shape_cast %55 : vector<1x256xf32> to vector<1x1x256xf32>
    tpu.vector_store %arg4[%c0_33, %c0_34, %c0_35], %58 {strides = array<i32>} : memref<6x1x256xf32, #tpu.memory_space<vmem>>, vector<1x1x256xf32>,
    %c1_36 = arith.constant 1 : index
    %59 = memref.load %arg3[%c1_36] : memref<3xf32, #tpu.memory_space<smem>>
    %60 = vector.broadcast %59 : f32 to vector<1x256xf32>
    %61 = arith.addf %48, %60 : vector<1x256xf32>
    %c1_37 = arith.constant 1 : index
    %c0_38 = arith.constant 0 : index
    %c0_39 = arith.constant 0 : index
    %62 = vector.load %arg4[%c1_37, %c0_38, %c0_39] : memref<6x1x256xf32, #tpu.memory_space<vmem>>, vector<1x1x256xf32>
    %63 = vector.shape_cast %62 : vector<1x1x256xf32> to vector<1x256xf32>
    %64 = vector.shape_cast %61 : vector<1x256xf32> to vector<1x1x256xf32>
    tpu.vector_store %arg4[%c1_37, %c0_38, %c0_39], %64 {strides = array<i32>} : memref<6x1x256xf32, #tpu.memory_space<vmem>>, vector<1x1x256xf32>,
    %c2_40 = arith.constant 2 : index
    %65 = memref.load %arg3[%c2_40] : memref<3xf32, #tpu.memory_space<smem>>
    %66 = vector.broadcast %65 : f32 to vector<1x256xf32>
    %67 = arith.addf %52, %66 : vector<1x256xf32>
    %c2_41 = arith.constant 2 : index
    %c0_42 = arith.constant 0 : index
    %c0_43 = arith.constant 0 : index
    %68 = vector.load %arg4[%c2_41, %c0_42, %c0_43] : memref<6x1x256xf32, #tpu.memory_space<vmem>>, vector<1x1x256xf32>
    %69 = vector.shape_cast %68 : vector<1x1x256xf32> to vector<1x256xf32>
    %70 = vector.shape_cast %67 : vector<1x256xf32> to vector<1x1x256xf32>
    tpu.vector_store %arg4[%c2_41, %c0_42, %c0_43], %70 {strides = array<i32>} : memref<6x1x256xf32, #tpu.memory_space<vmem>>, vector<1x1x256xf32>,
    %c4 = arith.constant 4 : index
    %c0_44 = arith.constant 0 : index
    %c0_45 = arith.constant 0 : index
    %71 = vector.load %arg1[%c4, %c0_44, %c0_45] : memref<8x1x256xf32, #tpu.memory_space<vmem>>, vector<1x1x256xf32>
    %72 = vector.shape_cast %71 : vector<1x1x256xf32> to vector<1x256xf32>
    %c0_46 = arith.constant 0 : index
    %c0_47 = arith.constant 0 : index
    %73 = memref.load %arg2[%c0_46, %c0_47] : memref<3x4xf32, #tpu.memory_space<smem>>
    %74 = vector.broadcast %73 : f32 to vector<1x256xf32>
    %75 = arith.mulf %72, %74 : vector<1x256xf32>
    %c1_48 = arith.constant 1 : index
    %c0_49 = arith.constant 0 : index
    %76 = memref.load %arg2[%c1_48, %c0_49] : memref<3x4xf32, #tpu.memory_space<smem>>
    %77 = vector.broadcast %76 : f32 to vector<1x256xf32>
    %78 = arith.mulf %72, %77 : vector<1x256xf32>
    %c2_50 = arith.constant 2 : index
    %c0_51 = arith.constant 0 : index
    %79 = memref.load %arg2[%c2_50, %c0_51] : memref<3x4xf32, #tpu.memory_space<smem>>
    %80 = vector.broadcast %79 : f32 to vector<1x256xf32>
    %81 = arith.mulf %72, %80 : vector<1x256xf32>
    %c5 = arith.constant 5 : index
    %c0_52 = arith.constant 0 : index
    %c0_53 = arith.constant 0 : index
    %82 = vector.load %arg1[%c5, %c0_52, %c0_53] : memref<8x1x256xf32, #tpu.memory_space<vmem>>, vector<1x1x256xf32>
    %83 = vector.shape_cast %82 : vector<1x1x256xf32> to vector<1x256xf32>
    %c0_54 = arith.constant 0 : index
    %c1_55 = arith.constant 1 : index
    %84 = memref.load %arg2[%c0_54, %c1_55] : memref<3x4xf32, #tpu.memory_space<smem>>
    %85 = vector.broadcast %84 : f32 to vector<1x256xf32>
    %86 = arith.mulf %83, %85 : vector<1x256xf32>
    %87 = arith.addf %75, %86 : vector<1x256xf32>
    %c1_56 = arith.constant 1 : index
    %c1_57 = arith.constant 1 : index
    %88 = memref.load %arg2[%c1_56, %c1_57] : memref<3x4xf32, #tpu.memory_space<smem>>
    %89 = vector.broadcast %88 : f32 to vector<1x256xf32>
    %90 = arith.mulf %83, %89 : vector<1x256xf32>
    %91 = arith.addf %78, %90 : vector<1x256xf32>
    %c2_58 = arith.constant 2 : index
    %c1_59 = arith.constant 1 : index
    %92 = memref.load %arg2[%c2_58, %c1_59] : memref<3x4xf32, #tpu.memory_space<smem>>
    %93 = vector.broadcast %92 : f32 to vector<1x256xf32>
    %94 = arith.mulf %83, %93 : vector<1x256xf32>
    %95 = arith.addf %81, %94 : vector<1x256xf32>
    %c6 = arith.constant 6 : index
    %c0_60 = arith.constant 0 : index
    %c0_61 = arith.constant 0 : index
    %96 = vector.load %arg1[%c6, %c0_60, %c0_61] : memref<8x1x256xf32, #tpu.memory_space<vmem>>, vector<1x1x256xf32>
    %97 = vector.shape_cast %96 : vector<1x1x256xf32> to vector<1x256xf32>
    %c0_62 = arith.constant 0 : index
    %c2_63 = arith.constant 2 : index
    %98 = memref.load %arg2[%c0_62, %c2_63] : memref<3x4xf32, #tpu.memory_space<smem>>
    %99 = vector.broadcast %98 : f32 to vector<1x256xf32>
    %100 = arith.mulf %97, %99 : vector<1x256xf32>
    %101 = arith.addf %87, %100 : vector<1x256xf32>
    %c1_64 = arith.constant 1 : index
    %c2_65 = arith.constant 2 : index
    %102 = memref.load %arg2[%c1_64, %c2_65] : memref<3x4xf32, #tpu.memory_space<smem>>
    %103 = vector.broadcast %102 : f32 to vector<1x256xf32>
    %104 = arith.mulf %97, %103 : vector<1x256xf32>
    %105 = arith.addf %91, %104 : vector<1x256xf32>
    %c2_66 = arith.constant 2 : index
    %c2_67 = arith.constant 2 : index
    %106 = memref.load %arg2[%c2_66, %c2_67] : memref<3x4xf32, #tpu.memory_space<smem>>
    %107 = vector.broadcast %106 : f32 to vector<1x256xf32>
    %108 = arith.mulf %97, %107 : vector<1x256xf32>
    %109 = arith.addf %95, %108 : vector<1x256xf32>
    %c7 = arith.constant 7 : index
    %c0_68 = arith.constant 0 : index
    %c0_69 = arith.constant 0 : index
    %110 = vector.load %arg1[%c7, %c0_68, %c0_69] : memref<8x1x256xf32, #tpu.memory_space<vmem>>, vector<1x1x256xf32>
    %111 = vector.shape_cast %110 : vector<1x1x256xf32> to vector<1x256xf32>
    %c0_70 = arith.constant 0 : index
    %c3_71 = arith.constant 3 : index
    %112 = memref.load %arg2[%c0_70, %c3_71] : memref<3x4xf32, #tpu.memory_space<smem>>
    %113 = vector.broadcast %112 : f32 to vector<1x256xf32>
    %114 = arith.mulf %111, %113 : vector<1x256xf32>
    %115 = arith.addf %101, %114 : vector<1x256xf32>
    %c1_72 = arith.constant 1 : index
    %c3_73 = arith.constant 3 : index
    %116 = memref.load %arg2[%c1_72, %c3_73] : memref<3x4xf32, #tpu.memory_space<smem>>
    %117 = vector.broadcast %116 : f32 to vector<1x256xf32>
    %118 = arith.mulf %111, %117 : vector<1x256xf32>
    %119 = arith.addf %105, %118 : vector<1x256xf32>
    %c2_74 = arith.constant 2 : index
    %c3_75 = arith.constant 3 : index
    %120 = memref.load %arg2[%c2_74, %c3_75] : memref<3x4xf32, #tpu.memory_space<smem>>
    %121 = vector.broadcast %120 : f32 to vector<1x256xf32>
    %122 = arith.mulf %111, %121 : vector<1x256xf32>
    %123 = arith.addf %109, %122 : vector<1x256xf32>
    %c0_76 = arith.constant 0 : index
    %124 = memref.load %arg3[%c0_76] : memref<3xf32, #tpu.memory_space<smem>>
    %125 = vector.broadcast %124 : f32 to vector<1x256xf32>
    %126 = arith.addf %115, %125 : vector<1x256xf32>
    %c3_77 = arith.constant 3 : index
    %c0_78 = arith.constant 0 : index
    %c0_79 = arith.constant 0 : index
    %127 = vector.load %arg4[%c3_77, %c0_78, %c0_79] : memref<6x1x256xf32, #tpu.memory_space<vmem>>, vector<1x1x256xf32>
    %128 = vector.shape_cast %127 : vector<1x1x256xf32> to vector<1x256xf32>
    %129 = vector.shape_cast %126 : vector<1x256xf32> to vector<1x1x256xf32>
    tpu.vector_store %arg4[%c3_77, %c0_78, %c0_79], %129 {strides = array<i32>} : memref<6x1x256xf32, #tpu.memory_space<vmem>>, vector<1x1x256xf32>,
    %c1_80 = arith.constant 1 : index
    %130 = memref.load %arg3[%c1_80] : memref<3xf32, #tpu.memory_space<smem>>
    %131 = vector.broadcast %130 : f32 to vector<1x256xf32>
    %132 = arith.addf %119, %131 : vector<1x256xf32>
    %c4_81 = arith.constant 4 : index
    %c0_82 = arith.constant 0 : index
    %c0_83 = arith.constant 0 : index
    %133 = vector.load %arg4[%c4_81, %c0_82, %c0_83] : memref<6x1x256xf32, #tpu.memory_space<vmem>>, vector<1x1x256xf32>
    %134 = vector.shape_cast %133 : vector<1x1x256xf32> to vector<1x256xf32>
    %135 = vector.shape_cast %132 : vector<1x256xf32> to vector<1x1x256xf32>
    tpu.vector_store %arg4[%c4_81, %c0_82, %c0_83], %135 {strides = array<i32>} : memref<6x1x256xf32, #tpu.memory_space<vmem>>, vector<1x1x256xf32>,
    %c2_84 = arith.constant 2 : index
    %136 = memref.load %arg3[%c2_84] : memref<3xf32, #tpu.memory_space<smem>>
    %137 = vector.broadcast %136 : f32 to vector<1x256xf32>
    %138 = arith.addf %123, %137 : vector<1x256xf32>
    %c5_85 = arith.constant 5 : index
    %c0_86 = arith.constant 0 : index
    %c0_87 = arith.constant 0 : index
    %139 = vector.load %arg4[%c5_85, %c0_86, %c0_87] : memref<6x1x256xf32, #tpu.memory_space<vmem>>, vector<1x1x256xf32>
    %140 = vector.shape_cast %139 : vector<1x1x256xf32> to vector<1x256xf32>
    %141 = vector.shape_cast %138 : vector<1x256xf32> to vector<1x1x256xf32>
    tpu.vector_store %arg4[%c5_85, %c0_86, %c0_87], %141 {strides = array<i32>} : memref<6x1x256xf32, #tpu.memory_space<vmem>>, vector<1x1x256xf32>,
    return
  }
  func.func @transform_0(%arg0: i32) -> (i32, i32, i32) {
    %c0_i32 = arith.constant 0 : i32
    %c0_i32_0 = arith.constant 0 : i32
    %c0_i32_1 = arith.constant 0 : i32
    return %c0_i32, %arg0, %c0_i32_0 : i32, i32, i32
  }
  func.func @transform_1(%arg0: i32) -> (i32, i32) {
    %c0_i32 = arith.constant 0 : i32
    %c0_i32_0 = arith.constant 0 : i32
    %c0_i32_1 = arith.constant 0 : i32
    return %c0_i32, %c0_i32_0 : i32, i32
  }
  func.func @transform_2(%arg0: i32) -> i32 {
    %c0_i32 = arith.constant 0 : i32
    %c0_i32_0 = arith.constant 0 : i32
    return %c0_i32 : i32
  }
  func.func @transform_3(%arg0: i32) -> (i32, i32, i32) {
    %c0_i32 = arith.constant 0 : i32
    %c0_i32_0 = arith.constant 0 : i32
    %c0_i32_1 = arith.constant 0 : i32
    return %c0_i32, %arg0, %c0_i32_0 : i32, i32, i32
  }
}

</mosaic_0001>

<bundles_post_ra>
// kernel: tpu_custom_call.1
= control target key start
LH: loop header
LB: loop body
LE: loop exit
PB: predicated region body
PF: predicated region fallthrough
CT: control target
= control target key end

     0   :  { %8 = vsyncpa [#allocation3], 0  ;;  %s438_s0 = inlined_call_operand.hbm [shape: f32[8,1,256], index: 0, kind: input, shape index: {}]   ;;  %s439_s1 = inlined_call_operand.hbm [shape: f32[3,4], index: 1, kind: input, shape index: {}]   ;;  %s440_s2 = inlined_call_operand.vmem [shape: f32[3], index: 2, kind: input, shape index: {}]   ;;  %s441_s3 = inlined_call_operand.hbm [shape: f32[6,1,256], index: 3, kind: output, shape index: {}]  }
   0x1   :  { %9 = vsyncpa [#allocation5], 0 }
   0x2   :  { %10 = vsyncpa [#allocation6], 0 }
   0x3   :  { %11 = vsyncpa [#allocation4], 0  ;;  %s16_s14 = sshll.u32 %s438_s0, 4  ;;  %s327_s15 = smov [#allocation2]   ;;  %s17_s14 = int_to_ptr.hbm [resolvable:$true] %s16_s14 }
   0x4   :  { %s18_s16 = sshll.u32 %s327_s15, 4  ;;  %s30_s19 = sshll.u32 %s439_s1, 4  ;;  %s19_s16 = int_to_ptr.vmem [resolvable:$true] %s18_s16  ;;  %s31_s19 = int_to_ptr.hbm [resolvable:$true] %s30_s19 }
   0x5   :  { %s328_s20 = smov 32   ;;  %s329_s21 = smov 2  }
   0x6   :  { %24 = dma.hbm_to_vmem [thread:$0]  %s17_s14, 256, %s19_s16, [#allocation3], %s328_s20, %s328_s20, %s329_s21  }
   0x7   :  { %s330_s22 = smov [#allocation7]   ;;  %s39_s0 = sshll.u32 %s440_s2, 4  ;;  %s40_s0 = int_to_ptr.vmem [resolvable:$true] %s39_s0 }
   0x8   :  { %33 = dma.hbm_to_smem %s31_s19, 64, %s330_s22, [#allocation5]  }
   0x9   :  { %s331_s25 = smov [#allocation8]  }
   0xa   :  { %42 = dma.vmem_to_smem %s40_s0, 16, %s331_s25, [#allocation6]  }
   0xb   :  { %319 = dma.done.wait [#allocation3], 256  }
   0xc   :  { %320 = vsyncadd [#allocation3], 4294967040 }
   0xd   :  { %321 = dma.done.wait [#allocation5], 64  }
   0xe   :  { %322 = vsyncadd [#allocation5], 4294967232 }
   0xf   :  { %323 = dma.done.wait [#allocation6], 16  }
  0x10   :  { %324 = vsyncadd [#allocation6], 4294967280 }
  0x11   :  { %55 = sfence }
  0x12   :  { %s57_s1 = sld [smem:[#allocation7]]  ;;  %v56_v0 = vld [vmem:[#allocation2] sm:$0x3]  ;;  %v369_v1 = vld [vmem:[#allocation2 + $0x8] sm:$0x3]  ;;  %v111_v10 = vlaneseq  ;;  %s332_s12 = smov [#allocation9]  }
  0x13   :  { %s217_s26 = sld [smem:[#allocation7 + $0x1]]  ;;  %v67_v2 = vld [vmem:[#allocation2 + $0x2] sm:$0x3]  ;;  %v373_v3 = vld [vmem:[#allocation2 + $0xa] sm:$0x3]  ;;  %s198_s13 = sshll.u32 %s332_s12, 4  ;;  %s199_s13 = int_to_ptr.vmem [resolvable:$true] %s198_s13 }
  0x14   :  { %s220_s27 = sld [smem:[#allocation7 + $0x2]]  ;;  %v81_v5 = vld [vmem:[#allocation2 + $0x4] sm:$0x3]  ;;  %v377_v6 = vld [vmem:[#allocation2 + $0xc] sm:$0x3]  ;;  %vm392_vm0 = vcmp.lt.s32.totalorder %v111_v10, 256 }
  0x15   :  { %s365_s28 = sld [smem:[#allocation7 + $0x3]]  ;;  %v95_v9 = vld [vmem:[#allocation2 + $0x6] sm:$0x3]  ;;  %v166_v15 = vld [vmem:[#allocation2 + $0xe] sm:$0x3]  ;;  %s200_s16 = sshll.u32 %s441_s3, 4  ;;  %s201_s16 = int_to_ptr.hbm [resolvable:$true] %s200_s16 }
  0x16   :  { %s367_s29 = sld [smem:[#allocation8]] }
  0x17   :  { %s371_s2 = sld [smem:[#allocation7 + $0x80]] }
  0x18   :  { %v58_v4 = vstv %s57_s1  ;;  %s375_s30 = sld [smem:[#allocation7 + $0x81]] }
  0x19   :  { %v59_v7 = vmul.f32 %v58_v4, %v56_v0  ;;  %v69_v8 = vstv %s217_s26  ;;  %s379_s4 = sld [smem:[#allocation7 + $0x82]]  ;;  %v130_v11 = vmul.f32 %v369_v1, %v58_v4 }
  0x1a   :  { %v70_v12 = vmul.f32 %v69_v8, %v67_v2  ;;  %v83_v13 = vstv %s220_s27  ;;  %s382_s5 = sld [smem:[#allocation7 + $0x83]]  ;;  %v141_v14 = vmul.f32 %v373_v3, %v69_v8 }
  0x1b   :  { %v84_v16 = vmul.f32 %v83_v13, %v81_v5  ;;  %v97_v17 = vstv %s365_s28  ;;  %s386_s6 = sld [smem:[#allocation8 + $0x1]]  ;;  %v155_v18 = vmul.f32 %v377_v6, %v83_v13 }
  0x1c   :  { %v71_v19 = vadd.f32 %v70_v12, %v59_v7  ;;  %v98_v20 = vmul.f32 %v97_v17, %v95_v9  ;;  %s389_s7 = sld [smem:[#allocation7 + $0x100]]  ;;  %v142_v21 = vadd.f32 %v141_v14, %v130_v11  ;;  %v109_v22 = vstv %s367_s29 }
  0x1d   :  { %v61_v24 = vstv %s371_s2  ;;  %s397_s8 = sld [smem:[#allocation7 + $0x101]]  ;;  %v169_v25 = vmul.f32 %v166_v15, %v97_v17 }
  0x1e   :  { %v85_v26 = vadd.f32 %v84_v16, %v71_v19  ;;  %v62_v27 = vmul.f32 %v61_v24, %v56_v0  ;;  %v73_v28 = vstv %s375_s30  ;;  %s400_s9 = sld [smem:[#allocation7 + $0x102]]  ;;  %v156_v29 = vadd.f32 %v155_v18, %v142_v21 }
  0x1f   :  { %v74_v30 = vmul.f32 %v73_v28, %v67_v2  ;;  %v87_v31 = vstv %s379_s4  ;;  %s403_s10 = sld [smem:[#allocation7 + $0x103]]  ;;  %v133_v32 = vmul.f32 %v369_v1, %v61_v24  ;;  %v145_v33 = vmul.f32 %v373_v3, %v73_v28 }
  0x20   :  { %v99_v34 = vadd.f32 %v98_v20, %v85_v26  ;;  %v88_v35 = vmul.f32 %v87_v31, %v81_v5  ;;  %v101_v36 = vstv %s382_s5  ;;  %v170_v37 = vadd.f32 %v169_v25, %v156_v29  ;;  %s409_s11 = sld [smem:[#allocation8 + $0x2]] }
  0x21   :  { %v75_v38 = vadd.f32 %v74_v30, %v62_v27  ;;  %v102_v39 = vmul.f32 %v101_v36, %v95_v9  ;;  %v117_v40 = vstv %s386_s6  ;;  %v146_v41 = vadd.f32 %v145_v33, %v133_v32 }
  0x22   :  { %v110_v42 = vadd.f32 %v109_v22, %v99_v34  ;;  %v64_v43 = vstv %s389_s7  ;;  %v181_v44 = vadd.f32 %v170_v37, %v109_v22  ;;  %v159_v45 = vmul.f32 %v377_v6, %v87_v31 }
  0x23   :  { %v89_v46 = vadd.f32 %v88_v35, %v75_v38  ;;  %v65_v47 = vmul.f32 %v64_v43, %v56_v0  ;;  %v77_v48 = vstv %s397_s8  ;;  %v173_v49 = vmul.f32 %v166_v15, %v101_v36 }
  0x24   :  { %115 = vst.msk [vmem:[#allocation9] sm:$0x3] %vm392_vm0, %v110_v42  ;;  %v78_v50 = vmul.f32 %v77_v48, %v67_v2  ;;  %v91_v51 = vstv %s400_s9  ;;  %v160_v52 = vadd.f32 %v159_v45, %v146_v41  ;;  %v136_v53 = vmul.f32 %v369_v1, %v64_v43 }
  0x25   :  { %v103_v54 = vadd.f32 %v102_v39, %v89_v46  ;;  %v92_v55 = vmul.f32 %v91_v51, %v81_v5  ;;  %v105_v56 = vstv %s403_s10  ;;  %183 = vst.msk [vmem:[#allocation9 + $0x6] sm:$0x3] %vm392_vm0, %v181_v44  ;;  %v149_v57 = vmul.f32 %v373_v3, %v77_v48 }
  0x26   :  { %v79_v58 = vadd.f32 %v78_v50, %v65_v47  ;;  %v106_v59 = vmul.f32 %v105_v56, %v95_v9  ;;  %v174_v60 = vadd.f32 %v173_v49, %v160_v52  ;;  %v163_v63 = vmul.f32 %v377_v6, %v91_v51 }
  0x27   :  { %v118_v61 = vadd.f32 %v117_v40, %v103_v54  ;;  %v150_v62 = vadd.f32 %v149_v57, %v136_v53  ;;  %v177_v0 = vmul.f32 %v166_v15, %v105_v56  ;;  %v122_v1 = vstv %s409_s11 }
  0x28   :  { %v93_v2 = vadd.f32 %v92_v55, %v79_v58  ;;  %v186_v4 = vadd.f32 %v174_v60, %v117_v40 }
  0x29   :  { %120 = vst.msk [vmem:[#allocation9 + $0x2] sm:$0x3] %vm392_vm0, %v118_v61  ;;  %v164_v5 = vadd.f32 %v163_v63, %v150_v62 }
  0x2a   :  { %v107_v7 = vadd.f32 %v106_v59, %v93_v2  ;;  %188 = vst.msk [vmem:[#allocation9 + $0x8] sm:$0x3] %vm392_vm0, %v186_v4 }
  0x2b   :  { %v178_v3 = vadd.f32 %v177_v0, %v164_v5 }
  0x2c   :  { %v123_v6 = vadd.f32 %v122_v1, %v107_v7 }
  0x2d   :  { %v191_v8 = vadd.f32 %v178_v3, %v122_v1 }
  0x2e   :  { %125 = vst.msk [vmem:[#allocation9 + $0x4] sm:$0x3] %vm392_vm0, %v123_v6 }
  0x2f   :  { %193 = vst.msk [vmem:[#allocation9 + $0xa] sm:$0x3] %vm392_vm0, %v191_v8 }
  0x30   :  { %206 = dma.vmem_to_hbm [thread:$0]  %s199_s13, 192, %s201_s16, [#allocation4], %s328_s20, %s328_s20, %s329_s21  }
  0x31   :  { %325 = dma.done.wait [#allocation4], 192  }
  0x32   :  { %326 = vsyncadd [#allocation4], 4294967104 }
  0x33   :  { %211 = vsyncpa [#allocation3], 1 }
  0x34   :  { %212 = vsyncpa [#allocation4], 1 }
  0x35   :  { %213 = vsyncpa [#allocation5], 1 }
  0x36   :  { %214 = vsyncpa [#allocation6], 1 }

</bundles_post_ra>
